<compile_context>
chip_gen: v6e
topology: v6e:2x2x1
jax: 0.10.0
libtpu: 0.0.40
codegen_flags: <defaults>
</compile_context>

<pallas_src>
import jax
import jax.numpy as jnp
from jax.experimental import pallas as pl
from jax.experimental.pallas import tpu as pltpu


# ----------------------------------------------------------------------------
# Single-sample kernel: one fused (3,5) VMEM input, scalar results via SMEM.
# ----------------------------------------------------------------------------
def _layer2_single_kernel(inp_ref, res_ref, idx_ref):
    inp = inp_ref[...]                       # (3, 5) f32 — fits in one vreg
    x = inp[0:1, :]                          # (1, 5)
    w1 = inp[1:2, :]
    w2 = inp[2:3, :]

    mid = x * w1                             # mid = x * self.w1
    sq = jnp.square(mid - jnp.float32(0.2))  # square(mid - mid_mean), mid_mean = 0.2

    t_m = jnp.max(sq)                        # .max() -> scalar
    n = sq.shape[-1]
    ids = jax.lax.broadcasted_iota(jnp.int32, sq.shape, 1)
    # First maximal index (matches jnp.argmax tie-breaking); reuses t_m.
    idx = jnp.min(jnp.where(sq == t_m, ids, jnp.int32(n)))

    # Packed scalar outputs in SMEM: [out, loss]
    res_ref[0, 0] = jnp.sum(mid * w2)        # return torch.sum(mid * self.w2)
    res_ref[0, 1] = t_m * jnp.float32(0.5)   # self.loss = t_m / 2
    idx_ref[0, 0] = idx


def layer2model_forward(x, w1, w2):
    """x, w1, w2: 1-D float32 arrays of length 5. Returns (out, loss, idx) scalars."""
    inp = jnp.stack([x, w1, w2]).astype(jnp.float32)   # (3, 5) — single input DMA

    res, idx = pl.pallas_call(
        _layer2_single_kernel,
        out_shape=(
            jax.ShapeDtypeStruct((1, 2), jnp.float32),  # [return value, self.loss]
            jax.ShapeDtypeStruct((1, 1), jnp.int32),    # idx
        ),
        in_specs=[pl.BlockSpec(memory_space=pltpu.MemorySpace.VMEM)],
        out_specs=(
            pl.BlockSpec(memory_space=pltpu.MemorySpace.SMEM),
            pl.BlockSpec(memory_space=pltpu.MemorySpace.SMEM),
        ),
    )(inp)

    return res[0, 0], res[0, 1], idx[0, 0]


# ----------------------------------------------------------------------------
# Batched kernel: amortize call overhead over B independent length-5 samples.
# ----------------------------------------------------------------------------
def _layer2_batched_kernel(params_ref, x_ref, res_ref, idx_ref):
    params = params_ref[...]                 # (2, 5): row 0 = w1, row 1 = w2
    w1 = params[0:1, :]
    w2 = params[1:2, :]
    x = x_ref[...]                           # (TB, 5)

    mid = x * w1                             # broadcast over rows
    sq = jnp.square(mid - jnp.float32(0.2))

    t_m = jnp.max(sq, axis=1, keepdims=True)             # (TB, 1) per-row max
    n = sq.shape[-1]
    ids = jax.lax.broadcasted_iota(jnp.int32, sq.shape, 1)
    idx = jnp.min(jnp.where(sq == t_m, ids, jnp.int32(n)),
                  axis=1, keepdims=True)                  # (TB, 1) first-maximal idx

    out = jnp.sum(mid * w2, axis=1, keepdims=True)        # (TB, 1)
    loss = t_m * jnp.float32(0.5)

    # Full-tile stores (avoid two width-1 masked column stores).
    res_ref[...] = jnp.concatenate([out, loss], axis=1)   # (TB, 2)
    idx_ref[...] = idx


def layer2model_forward_batched(x_batch, w1, w2, *, block_rows=8):
    """x_batch: (B, 5) f32, B a multiple of block_rows. Returns (out, loss, idx) per row."""
    B, n = x_batch.shape
    assert B % block_rows == 0, "pad the batch to a multiple of block_rows"
    params = jnp.stack([w1, w2]).astype(jnp.float32)      # (2, 5) — single constant block
    xb = x_batch.astype(jnp.float32)

    res, idx = pl.pallas_call(
        _layer2_batched_kernel,
        out_shape=(
            jax.ShapeDtypeStruct((B, 2), jnp.float32),    # columns: [out, loss]
            jax.ShapeDtypeStruct((B, 1), jnp.int32),
        ),
        grid=(B // block_rows,),
        in_specs=[
            pl.BlockSpec((2, n), lambda i: (0, 0)),               # w1/w2, reused every step
            pl.BlockSpec((block_rows, n), lambda i: (i, 0)),      # per-step row block
        ],
        out_specs=(
            pl.BlockSpec((block_rows, 2), lambda i: (i, 0)),
            pl.BlockSpec((block_rows, 1), lambda i: (i, 0)),
        ),
        compiler_params=pltpu.CompilerParams(
            dimension_semantics=("parallel",)),
    )(params, xb)

    return res[:, 0], res[:, 1], idx[:, 0]


# ----------------------------------------------------------------------------
# Pure-JAX reference (same semantics as the PyTorch forward, broken lines omitted)
# ----------------------------------------------------------------------------
def _reference(x, w1, w2):
    mid = x * w1
    sq = jnp.square(mid - 0.2)
    t_m = jnp.max(sq)
    return jnp.sum(mid * w2), t_m * 0.5, jnp.argmax(sq).astype(jnp.int32)


if __name__ == "__main__":
    # Deterministic parameter init, exactly as the module's __init__.
    w1 = jnp.array([0.8, -0.1, -0.1, -0.1, -0.1], dtype=jnp.float32)
    w2 = 0.5 * jnp.ones((5,), dtype=jnp.float32)

    key = jax.random.PRNGKey(0)
    k_single, k_batch = jax.random.split(key)
    x = jax.random.normal(k_single, (5,), dtype=jnp.float32)
    xb = jax.random.normal(k_batch, (16, 5), dtype=jnp.float32)

    # --- single-sample path ---
    out, loss, idx = layer2model_forward(x, w1, w2)
    jax.block_until_ready((out, loss, idx))
    ref_out, ref_loss, ref_idx = _reference(x, w1, w2)
    assert jnp.allclose(out, ref_out, rtol=1e-6, atol=1e-6), (out, ref_out)
    assert jnp.allclose(loss, ref_loss, rtol=1e-6, atol=1e-6), (loss, ref_loss)
    assert int(idx) == int(ref_idx), (idx, ref_idx)

    # --- batched path (amortized call overhead) ---
    outs, losses, idxs = layer2model_forward_batched(xb, w1, w2)
    jax.block_until_ready((outs, losses, idxs))
    ref_outs, ref_losses, ref_idxs = jax.vmap(_reference, in_axes=(0, None, None))(xb, w1, w2)
    assert jnp.allclose(outs, ref_outs, rtol=1e-6, atol=1e-6), (outs, ref_outs)
    assert jnp.allclose(losses, ref_losses, rtol=1e-6, atol=1e-6), (losses, ref_losses)
    assert jnp.array_equal(idxs.astype(jnp.int32), ref_idxs.astype(jnp.int32)), (idxs, ref_idxs)

    print("KERNEL_OK")
</pallas_src>

<mosaic_0001>
module attributes {stable_mosaic.version = 11 : i64} {
  func.func @_layer2_single_kernel(%arg0: memref<3x5xf32, #tpu.memory_space<vmem>>, %arg1: memref<1x2xf32, #tpu.memory_space<smem>>, %arg2: memref<1x1xi32, #tpu.memory_space<smem>>) attributes {dimension_semantics = [], scalar_prefetch = 0 : i64, scratch_operands = 0 : i64, tpu.core_type = #tpu.core_type<tc>} {
    %c0 = arith.constant 0 : index
    %c0_0 = arith.constant 0 : index
    %0 = vector.load %arg0[%c0, %c0_0] : memref<3x5xf32, #tpu.memory_space<vmem>>, vector<3x5xf32>
    %1 = vector.extract_strided_slice %0 {offsets = [0, 0], sizes = [1, 5], strides = [1, 1]} : vector<3x5xf32> to vector<1x5xf32>
    %2 = vector.extract_strided_slice %0 {offsets = [1, 0], sizes = [1, 5], strides = [1, 1]} : vector<3x5xf32> to vector<1x5xf32>
    %3 = vector.extract_strided_slice %0 {offsets = [2, 0], sizes = [1, 5], strides = [1, 1]} : vector<3x5xf32> to vector<1x5xf32>
    %4 = arith.mulf %1, %2 : vector<1x5xf32>
    %cst = arith.constant 2.000000e-01 : f32
    %5 = vector.broadcast %cst : f32 to vector<1x5xf32>
    %6 = arith.subf %4, %5 : vector<1x5xf32>
    %7 = arith.mulf %6, %6 : vector<1x5xf32>
    %8 = vector.shape_cast %7 : vector<1x5xf32> to vector<1x1x5xf32>
    %cst_1 = arith.constant dense<0xFF800000> : vector<1xf32>
    %9 = vector.multi_reduction <maximumf>, %8, %cst_1 [1, 2] : vector<1x1x5xf32> to vector<1xf32>
    %10 = vector.shape_cast %9 : vector<1xf32> to vector<1x1x1xf32>
    %11 = vector.extract %10[0, 0, 0] : f32 from vector<1x1x1xf32>
    %12 = tpu.iota {dimensions = array<i32: 1>} : vector<1x5xi32>
    %13 = vector.broadcast %11 : f32 to vector<1x5xf32>
    %14 = arith.cmpf oeq, %7, %13 : vector<1x5xf32>
    %c5_i32 = arith.constant 5 : i32
    %15 = vector.broadcast %c5_i32 : i32 to vector<1x5xi32>
    %16 = arith.select %14, %12, %15 : vector<1x5xi1>, vector<1x5xi32>
    %17 = vector.shape_cast %16 : vector<1x5xi32> to vector<1x1x5xi32>
    %cst_2 = arith.constant dense<2147483647> : vector<1xi32>
    %18 = vector.multi_reduction <minsi>, %17, %cst_2 [1, 2] : vector<1x1x5xi32> to vector<1xi32>
    %19 = vector.shape_cast %18 : vector<1xi32> to vector<1x1x1xi32>
    %20 = vector.extract %19[0, 0, 0] : i32 from vector<1x1x1xi32>
    %21 = arith.mulf %4, %3 : vector<1x5xf32>
    %22 = vector.shape_cast %21 : vector<1x5xf32> to vector<1x1x5xf32>
    %cst_3 = arith.constant dense<0.000000e+00> : vector<1xf32>
    %23 = vector.multi_reduction <add>, %22, %cst_3 [1, 2] : vector<1x1x5xf32> to vector<1xf32>
    %24 = vector.shape_cast %23 : vector<1xf32> to vector<1x1x1xf32>
    %25 = vector.extract %24[0, 0, 0] : f32 from vector<1x1x1xf32>
    %c0_4 = arith.constant 0 : index
    %c0_5 = arith.constant 0 : index
    %26 = memref.load %arg1[%c0_4, %c0_5] : memref<1x2xf32, #tpu.memory_space<smem>>
    memref.store %25, %arg1[%c0_4, %c0_5] : memref<1x2xf32, #tpu.memory_space<smem>>
    %cst_6 = arith.constant 5.000000e-01 : f32
    %27 = arith.mulf %11, %cst_6 : f32
    %c0_7 = arith.constant 0 : index
    %c1 = arith.constant 1 : index
    %28 = memref.load %arg1[%c0_7, %c1] : memref<1x2xf32, #tpu.memory_space<smem>>
    memref.store %27, %arg1[%c0_7, %c1] : memref<1x2xf32, #tpu.memory_space<smem>>
    %c0_8 = arith.constant 0 : index
    %c0_9 = arith.constant 0 : index
    %29 = memref.load %arg2[%c0_8, %c0_9] : memref<1x1xi32, #tpu.memory_space<smem>>
    memref.store %20, %arg2[%c0_8, %c0_9] : memref<1x1xi32, #tpu.memory_space<smem>>
    return
  }
}

</mosaic_0001>

<bundles_post_ra>
// kernel: tpu_custom_call.1
= control target key start
LH: loop header
LB: loop body
LE: loop exit
PB: predicated region body
PF: predicated region fallthrough
CT: control target
= control target key end

     0   :  { %8 = vsyncpa [#allocation3], 0  ;;  %s200_s0 = inlined_call_operand.hbm [shape: f32[3,5], index: 0, kind: input, shape index: {}]   ;;  %s201_s1 = inlined_call_operand.hbm [shape: f32[1,2], index: 1, kind: output, shape index: {0}]   ;;  %s202_s2 = inlined_call_operand.hbm [shape: s32[1,1], index: 2, kind: output, shape index: {1}]  }
   0x1   :  { %9 = vsyncpa [#allocation4], 0 }
   0x2   :  { %10 = vsyncpa [#allocation7], 0  ;;  %s170_s9 = smov [#allocation2]  }
   0x3   :  { %s17_s10 = sshll.u32 %s170_s9, 4  ;;  %s18_s10 = int_to_ptr.vmem [resolvable:$true] %s17_s10 }
   0x4   :  { %s136_s11 = scalar_lea.vmem %s18_s10, 64  ;;  %p141_p1 = scmp.lt.s32.totalorder %s18_s10, %s18_s10 }
   0x5   :  { %p137_p0 = scmp.ne.s32.totalorder %s18_s10, %s136_s11  ;;  %p142_p2 = scmp.lt.s32.totalorder %s136_s11, %s136_s11 }
   0x7   :  { %p143_p3 = por %p142_p2, %p141_p1 }
   0x9   :  { %p144_p4 = pnand %p143_p3, %p137_p0 }
   0xb   :  { %147 = shalt.err (!%p144_p4)
}
   0xc   :  { %20 = dma.hbm_to_vmem [thread:$0]  %s200_s0, 64, %s18_s10, [#allocation3]  }
   0xd   :  { %164 = dma.done.wait [#allocation3], 64  }
   0xe   :  { %165 = vsyncadd [#allocation3], 4294967232  ;;  %v24_v0 = vld [vmem:[#allocation2] sm:$0x7]  ;;  %vm31_vm0 = vcmask 32768   ;;  %v42_v13 = vlaneseq  ;;  %s171_s17 = smov [#allocation5]  }
   0xf   :  { %v26_v1 = vrot.slane %v24_v0, 1  ;;  %v72_v21 = vrot.slane %v24_v0, 2  ;;  %s172_s20 = smov [#allocation6]  }
  0x10   :  { %v43_v14 = vand.u32 127, %v42_v13 }
  0x11   :  { %v28_v2 = vmul.f32 %v26_v1, %v24_v0 }
  0x13   :  { %v118_v3 = vadd.f32 -0.2, %v28_v2  ;;  %v74_v24 = vmul.f32 %v72_v21, %v28_v2 }
  0x15   :  { %v30_v4 = vmul.f32 %v118_v3, %v118_v3  ;;  %v75_v26 = vsel %vm31_vm0, %v74_v24, 0.0 }
  0x17   :  { %v32_v5 = vsel %vm31_vm0, %v30_v4, -inf }
  0x18   :  { %33 = vmax.xlane.f32.xlu0 %v32_v5 }
  0xa1   :  { %v34_v6 = vpop.xlane.xlu0 %33 }
  0xa2   :  { %v35_v7 = vrot.slane %v34_v6, 4 }
  0xa4   :  { %v36_v8 = vmax.f32 %v34_v6, %v35_v7 }
  0xa6   :  { %v37_v9 = vrot.slane %v36_v8, 2 }
  0xa8   :  { %v38_v10 = vmax.f32 %v36_v8, %v37_v9 }
  0xaa   :  { %v39_v11 = vrot.slane %v38_v10, 1 }
  0xac   :  { %v40_v12 = vmax.f32 %v38_v10, %v39_v11 }
  0xae   :  { %119 = vpush %v40_v12 }
  0xdf   :  { %s120_s0 = spop %119 }
  0xe0   :  { %v44_v15 = vstv %s120_s0  ;;  %s87_s14 = smul.f32 0.5, %s120_s0 }
  0xe1   :  { %vm45_vm1 = vcmp.eq.f32.partialorder %v30_v4, %v44_v15 }
  0xe2   :  { %v46_v16 = vsel %vm45_vm1, %v43_v14, 5  ;;  %89 = sst [smem:[#allocation5 + $0x1]] %s87_s14 }
  0xe3   :  { %v47_v17 = vsel %vm31_vm0, %v46_v16, 2147483647 }
  0xe4   :  { %v49_v18 = vshra.s32 %v47_v17, 16  ;;  %v48_v20 = vand.u32 65535, %v47_v17 }
  0xe6   :  { %v51_v19 = vcvt.s32.f32 %v49_v18  ;;  %v50_v23 = vcvt.s32.f32 %v48_v20 }
  0xe8   :  { %52 = vmin.xlane.f32.xlu0 %v51_v19 }
 0x171   :  { %v53_v22 = vpop.xlane.xlu0 %52 }
 0x172   :  { %vm54_vm2 = vcmp.eq.f32.partialorder %v51_v19, %v53_v22  ;;  %v59_v27 = vcvt.f32.s32 %v53_v22 }
 0x173   :  { %v55_v25 = vsel %vm54_vm2, %v50_v23, inf }
 0x174   :  { %56 = vmin.xlane.f32.xlu1 %v55_v25  ;;  %v60_v29 = vshll.u32 %v59_v27, 16 }
 0x178   :  { %76 = vadd.xlane.f32.xlu1 %v75_v26 }
 0x1fd   :  { %v57_v28 = vpop.xlane.xlu1 %56 }
 0x1fe   :  { %v58_v30 = vcvt.f32.s32 %v57_v28 }
 0x200   :  { %v61_v31 = vadd.s32 %v60_v29, %v58_v30 }
 0x201   :  { %v77_v32 = vpop.xlane.xlu1 %76 }
 0x202   :  { %v62_v33 = vrot.slane %v61_v31, 4  ;;  %v78_v34 = vrot.slane %v77_v32, 4 }
 0x204   :  { %vm63_vm3 = vcmp.lt.s32.totalorder %v61_v31, %v62_v33  ;;  %v79_v35 = vadd.f32 %v78_v34, %v77_v32 }
 0x205   :  { %v64_v36 = vsel %vm63_vm3, %v61_v31, %v62_v33 }
 0x206   :  { %v80_v37 = vrot.slane %v79_v35, 2  ;;  %v65_v38 = vrot.slane %v64_v36, 2 }
 0x208   :  { %v81_v39 = vadd.f32 %v80_v37, %v79_v35  ;;  %vm66_vm4 = vcmp.lt.s32.totalorder %v64_v36, %v65_v38 }
 0x209   :  { %v67_v40 = vsel %vm66_vm4, %v64_v36, %v65_v38 }
 0x20a   :  { %v68_v41 = vrot.slane %v67_v40, 1  ;;  %v82_v42 = vrot.slane %v81_v39, 1 }
 0x20c   :  { %vm69_vm5 = vcmp.lt.s32.totalorder %v67_v40, %v68_v41  ;;  %v83_v43 = vadd.f32 %v82_v42, %v81_v39 }
 0x20d   :  { %v70_v44 = vsel %vm69_vm5, %v67_v40, %v68_v41 }
 0x20e   :  { %121 = vpush %v70_v44 }
 0x20f   :  { %123 = vpush %v83_v43 }
 0x23f   :  { %s122_s15 = spop %121 }
 0x240   :  { %91 = sst [smem:[#allocation6]] %s122_s15  ;;  %s124_s16 = spop %123 }
 0x241   :  { %86 = sst [smem:[#allocation5]] %s124_s16 }
 0x242   :  { %99 = dma.smem_to_hbm %s171_s17, 16, %s201_s1, [#allocation4]  }
 0x243   :  { %107 = dma.smem_to_hbm %s172_s20, 16, %s202_s2, [#allocation7]  }
 0x244   :  { %166 = dma.done.wait [#allocation4], 16  }
 0x245   :  { %167 = vsyncadd [#allocation4], 4294967280 }
 0x246   :  { %168 = dma.done.wait [#allocation7], 16  }
 0x247   :  { %169 = vsyncadd [#allocation7], 4294967280 }
 0x248   :  { %114 = sfence }
 0x249   :  { %115 = vsyncpa [#allocation3], 1 }
 0x24a   :  { %116 = vsyncpa [#allocation4], 1 }
 0x24b   :  { %117 = vsyncpa [#allocation7], 1 }

</bundles_post_ra>
